<compile_context>
chip_gen: v6e
topology: v6e:2x2x1
jax: 0.10.0
libtpu: 0.0.40
codegen_flags: <defaults>
</compile_context>

<pallas_src>
import functools
import sys

import jax
import jax.numpy as jnp
from jax.experimental import pallas as pl
from jax.experimental.pallas import tpu as pltpu


def _round_up(x, m):
    return ((x + m - 1) // m) * m


def _vmem_capacity_bytes():
    """Physical per-TensorCore VMEM, with a conservative (v7x-sized) fallback."""
    try:
        cap = getattr(pltpu.get_tpu_info(), "vmem_capacity_bytes", None)
        if cap:
            return int(cap)
    except Exception:
        pass
    return 64 * 1024 * 1024


def resmlp_block_kernel(
    x_ref,        # (1, N_pad, D)  f32 : all tokens of this image
    alpha1_ref,   # (1, D)         f32
    beta1_ref,    # (1, D)         f32
    attn_w_ref,   # (TN, N_pad)    bf16: row slab of the token-mixing weight
    attn_b_ref,   # (TN, 1)        f32 : token-mixing bias column (row slab)
    gamma1_ref,   # (1, D)         f32
    alpha2_ref,   # (1, D)         f32
    beta2_ref,    # (1, D)         f32
    w1_ref,       # (D, H_pad)     bf16
    b1_ref,       # (1, H_pad)     f32
    w2_ref,       # (H_pad, D)     bf16
    gamma2_ref,   # (1, D)         f32
    g2b2_ref,     # (1, D)         f32 : gamma2 * fc2-bias, pre-folded
    o_ref,        # (1, TN, D)
    acc_ref,      # (TN, D)        f32 scratch : MLP accumulator
    *,
    block_h,
    num_h_chunks,
    row_tiles,
    tn,
    approx_gelu,
):
    f32, bf16 = jnp.float32, jnp.bfloat16
    x_full = x_ref[0]                                                # (N_pad, D) f32

    # ---- token-mixing branch: rows of  W_attn @ (alpha1 * x + beta1) + b_attn ----
    t = (alpha1_ref[...] * x_full + beta1_ref[...]).astype(bf16)
    z = jnp.dot(attn_w_ref[...], t, preferred_element_type=f32)      # (TN, D) f32

    # Residual rows for this slab are re-sliced from the resident x tile
    # (no separate x_rows HBM stream / VMEM buffer).
    if row_tiles == 1:
        x_rows = x_full                                              # (TN, D)
    else:
        lo = pl.multiple_of(pl.program_id(1) * tn, tn)
        x_rows = x_ref[0, pl.ds(lo, tn), :]

    x1 = x_rows + gamma1_ref[...] * (z + attn_b_ref[...])            # (TN, D) f32

    # ---- channel-mixing MLP, chunked over the hidden dim ---------------------
    u = (alpha2_ref[...] * x1 + beta2_ref[...]).astype(bf16)         # (TN, D)

    def h_chunk(lo):
        h = jnp.dot(u, w1_ref[:, pl.ds(lo, block_h)],
                    preferred_element_type=f32)                      # (TN, block_h)
        h = jax.nn.gelu(h + b1_ref[:, pl.ds(lo, block_h)], approximate=approx_gelu)
        return jnp.dot(h.astype(bf16), w2_ref[pl.ds(lo, block_h), :],
                       preferred_element_type=f32)                   # (TN, D) f32

    # Chunk 0 peeled: initialises the accumulator without an extra zero/bias store.
    acc_ref[...] = h_chunk(0)
    if num_h_chunks > 1:
        def body(c, carry):
            acc_ref[...] += h_chunk(pl.multiple_of(c * block_h, block_h))
            return carry
        jax.lax.fori_loop(1, num_h_chunks, body, None, unroll=True)

    # gamma2 * b2 was pre-folded in the wrapper (g2b2).
    o_ref[0] = (x1 + gamma2_ref[...] * acc_ref[...] + g2b2_ref[...]).astype(o_ref.dtype)


def resmlp_block(x, params, *, block_h=None, row_tiles=None, approx_gelu=True):
    """ResMLP block forward.  x: (B, N, D) float32; params: dict (see init_params).

    approx_gelu=True (default) uses the tanh approximation (EUP path; recommended on
    v6e/v7x).  approx_gelu=False matches torch.nn.GELU (erf) exactly at VPU cost.
    """
    B, N, D = x.shape
    H = params["w1"].shape[1]

    # --- generation-aware tuning ----------------------------------------------
    vmem_cap = _vmem_capacity_bytes()
    vmem_limit = max(32 * 1024 * 1024,
                     min(vmem_cap - 16 * 1024 * 1024, 112 * 1024 * 1024))
    if row_tiles is None:
        # v5e/v6e: single TensorCore -> row tiling only adds DMA/recompute.
        # v7x: the "parallel" batch axis already feeds both cores when B >= 2;
        # pass row_tiles=2 explicitly only for B == 1.
        row_tiles = 1
    row_tiles = max(1, int(row_tiles))
    if block_h is None:
        # Full-H chunks on 128 MiB VMEM parts (v5e/v6e); 512-wide chunks on v7x.
        block_h = H if vmem_cap >= 96 * 1024 * 1024 else 512
    block_h = int(min(block_h, H))
    num_h_chunks = -(-H // block_h)
    H_pad = num_h_chunks * block_h

    # --- tile / padding geometry ----------------------------------------------
    sub = 16 * row_tiles                      # whole bf16 sublane tiles per row slab
    N_pad = _round_up(N, sub)
    n128 = _round_up(N_pad, 128)
    if n128 - N_pad <= N_pad // 8:            # lane-dense contraction dim when ~free
        N_pad = _round_up(n128, sub)
    TN = N_pad // row_tiles

    def pad_to(a, shape):
        pads = [(0, s - d) for d, s in zip(a.shape, shape)]
        return jnp.pad(a, pads) if any(p for _, p in pads) else a

    f32, bf16 = jnp.float32, jnp.bfloat16
    x_p = pad_to(x, (B, N_pad, D)).astype(f32)
    # Zero padding of attn_w columns guarantees padded tokens never leak into
    # real rows of the token-mixing contraction.
    attn_w = pad_to(params["attn_w"], (N_pad, N_pad)).astype(bf16)
    attn_b = pad_to(params["attn_b"], (N_pad, 1)).astype(f32)
    w1 = pad_to(params["w1"], (D, H_pad)).astype(bf16)
    b1 = pad_to(params["b1"], (1, H_pad)).astype(f32)
    w2 = pad_to(params["w2"], (H_pad, D)).astype(bf16)

    alpha1 = params["alpha1"].astype(f32); beta1 = params["beta1"].astype(f32)
    alpha2 = params["alpha2"].astype(f32); beta2 = params["beta2"].astype(f32)
    gamma1 = params["gamma1"].astype(f32); gamma2 = params["gamma2"].astype(f32)
    g2b2 = (params["gamma2"] * params["b2"]).astype(f32)       # fc2 bias, pre-folded

    kernel = functools.partial(
        resmlp_block_kernel, block_h=block_h, num_h_chunks=num_h_chunks,
        row_tiles=row_tiles, tn=TN, approx_gelu=approx_gelu)

    flops = B * (2 * N_pad * N_pad * D + 4 * N_pad * D * H_pad)
    transcendentals = B * N_pad * H_pad
    bytes_accessed = (2 * B * N_pad * D * 4        # x in + out
                      + B * N_pad * N_pad * 2      # attn_w slabs streamed per image
                      + B * N_pad * 4              # attn bias column slabs
                      + 2 * D * H_pad * 2          # w1 + w2 (bf16), VMEM-resident
                      + (H_pad + 8 * D) * 4)       # small f32 parameter vectors

    def build(single_buffer_weights):
        vec = lambda: pl.BlockSpec((1, D), lambda b, t: (0, 0))
        # Grid-invariant weights: single VMEM buffer when supported.
        wkw = dict(pipeline_mode=pl.Buffered(1)) if single_buffer_weights else {}
        in_specs = [
            pl.BlockSpec((1, N_pad, D), lambda b, t: (b, 0, 0)),     # x, all tokens
            vec(),                                                   # alpha1
            vec(),                                                   # beta1
            pl.BlockSpec((TN, N_pad), lambda b, t: (t, 0)),          # attn_w row slab
            pl.BlockSpec((TN, 1),     lambda b, t: (t, 0)),          # attn_b row slab
            vec(),                                                   # gamma1
            vec(),                                                   # alpha2
            vec(),                                                   # beta2
            pl.BlockSpec((D, H_pad), lambda b, t: (0, 0), **wkw),    # w1 (bf16)
            pl.BlockSpec((1, H_pad), lambda b, t: (0, 0)),           # b1
            pl.BlockSpec((H_pad, D), lambda b, t: (0, 0), **wkw),    # w2 (bf16)
            vec(),                                                   # gamma2
            vec(),                                                   # gamma2 * b2
        ]
        return pl.pallas_call(
            kernel,
            out_shape=jax.ShapeDtypeStruct((B, N_pad, D), x.dtype),
            grid_spec=pltpu.PrefetchScalarGridSpec(
                num_scalar_prefetch=0,
                grid=(B, row_tiles),
                in_specs=in_specs,
                out_specs=pl.BlockSpec((1, TN, D), lambda b, t: (b, t, 0)),
                scratch_shapes=[pltpu.VMEM((TN, D), jnp.float32)],
            ),
            compiler_params=pltpu.CompilerParams(
                dimension_semantics=("parallel", "parallel"),
                vmem_limit_bytes=vmem_limit,
            ),
            cost_estimate=pl.CostEstimate(flops=flops,
                                          transcendentals=transcendentals,
                                          bytes_accessed=bytes_accessed),
        )

    args = (x_p, alpha1, beta1, attn_w, attn_b, gamma1,
            alpha2, beta2, w1, b1, w2, gamma2, g2b2)
    try:
        out = build(single_buffer_weights=True)(*args)
    except Exception as e:  # noqa: BLE001 -- the unsupported-pipeline_mode error type
        # varies across jax builds; log (not silent) and retry with default buffering.
        print("[resmlp_block] pl.Buffered(1) weight path failed "
              f"({type(e).__name__}: {e}); falling back to double-buffered weights.",
              file=sys.stderr)
        out = build(single_buffer_weights=False)(*args)

    # Padded rows contain garbage (gelu(b1)@w2 + b2); slice them off.
    return out[:, :N, :] if N_pad != N else out


def init_params(key, dim, num_patches, init_values=1e-4, dtype=jnp.float32):
    hidden = int(4.0 * dim)
    k = jax.random.split(key, 6)
    scale_attn = 1.0 / jnp.sqrt(num_patches)
    scale_fc1 = 1.0 / jnp.sqrt(dim)
    scale_fc2 = 1.0 / jnp.sqrt(hidden)
    return {
        # Affine norm1 / norm2: alpha=1, beta=0 (as in __init__)
        "alpha1": jnp.ones((1, dim), dtype),
        "beta1":  jnp.zeros((1, dim), dtype),
        "alpha2": jnp.ones((1, dim), dtype),
        "beta2":  jnp.zeros((1, dim), dtype),
        # layer-scale gammas
        "gamma1": jnp.full((1, dim), init_values, dtype),
        "gamma2": jnp.full((1, dim), init_values, dtype),
        # token-mixing Linear(num_patches, num_patches): z = attn_w @ t + attn_b
        "attn_w": jax.random.uniform(k[0], (num_patches, num_patches), dtype,
                                     -scale_attn, scale_attn),
        "attn_b": jax.random.uniform(k[1], (num_patches, 1), dtype,
                                     -scale_attn, scale_attn),
        # Mlp: Linear(dim, 4*dim) -> GELU -> Linear(4*dim, dim), stored
        # (in_features, out_features) for right-multiply
        "w1": jax.random.uniform(k[2], (dim, hidden), dtype, -scale_fc1, scale_fc1),
        "b1": jax.random.uniform(k[3], (1, hidden), dtype, -scale_fc1, scale_fc1),
        "w2": jax.random.uniform(k[4], (hidden, dim), dtype, -scale_fc2, scale_fc2),
        "b2": jax.random.uniform(k[5], (1, dim), dtype, -scale_fc2, scale_fc2),
    }


def resmlp_block_ref(x, p, *, approx_gelu=True):
    """Pure-JAX f32 reference mirroring the PyTorch forward.

    approx_gelu=False reproduces torch.nn.GELU (erf) exactly.
    """
    t = p["alpha1"] * x + p["beta1"]                                    # (B,N,D)
    z = jnp.einsum("nm,bmd->bnd", p["attn_w"], t) + p["attn_b"][None, :, :]
    x = x + p["gamma1"] * z
    u = p["alpha2"] * x + p["beta2"]
    h = jax.nn.gelu(u @ p["w1"] + p["b1"], approximate=approx_gelu)
    m = h @ p["w2"] + p["b2"]
    return x + p["gamma2"] * m


if __name__ == "__main__":
    B, N, D = 2, 8, 16          # batch, num_patches, dim  (hidden = 4*D = 64)
    key = jax.random.PRNGKey(0)
    kx, kp = jax.random.split(key)

    x = jax.random.normal(kx, (B, N, D), jnp.float32)
    # init_values=0.1 so the (bf16) branch contributions are actually exercised
    # by the tolerance check (module default is 1e-4).
    params = init_params(kp, dim=D, num_patches=N, init_values=0.1)

    out = jax.block_until_ready(resmlp_block(x, params, approx_gelu=True))
    ref = resmlp_block_ref(x, params, approx_gelu=True)

    assert out.shape == (B, N, D)
    max_err = jnp.max(jnp.abs(out - ref))
    # Relaxed tolerance: kernel uses bf16 matmul operands with f32 accumulation.
    assert jnp.allclose(out, ref, rtol=2e-2, atol=3e-3), \
        f"mismatch vs reference (max abs err = {max_err})"

    print("KERNEL_OK")
</pallas_src>

<mosaic_0001>
module attributes {stable_mosaic.version = 11 : i64} {
  func.func @resmlp_block_kernel(%arg0: i32, %arg1: i32, %arg2: memref<1x16x16xf32, #tpu.memory_space<vmem>>, %arg3: memref<1x16xf32, #tpu.memory_space<vmem>>, %arg4: memref<1x16xf32, #tpu.memory_space<vmem>>, %arg5: memref<16x16xbf16, #tpu.memory_space<vmem>>, %arg6: memref<16x1xf32, #tpu.memory_space<vmem>>, %arg7: memref<1x16xf32, #tpu.memory_space<vmem>>, %arg8: memref<1x16xf32, #tpu.memory_space<vmem>>, %arg9: memref<1x16xf32, #tpu.memory_space<vmem>>, %arg10: memref<16x64xbf16, #tpu.memory_space<vmem>>, %arg11: memref<1x64xf32, #tpu.memory_space<vmem>>, %arg12: memref<64x16xbf16, #tpu.memory_space<vmem>>, %arg13: memref<1x16xf32, #tpu.memory_space<vmem>>, %arg14: memref<1x16xf32, #tpu.memory_space<vmem>>, %arg15: memref<1x16x16xf32, #tpu.memory_space<vmem>>, %arg16: memref<16x16xf32, #tpu.memory_space<vmem>>) attributes {dimension_semantics = [#tpu.dimension_semantics<parallel>, #tpu.dimension_semantics<parallel>], iteration_bounds = array<i64: 2, 1>, scalar_prefetch = 0 : i64, scratch_operands = 1 : i64, tpu.core_type = #tpu.core_type<tc>, window_params = [{transform_indices = @transform_0, window_bounds = array<i64: 1, 16, 16>}, {pipeline_mode = #tpu.pipeline_mode<synchronous>, transform_indices = @transform_1, window_bounds = array<i64: 1, 16>}, {pipeline_mode = #tpu.pipeline_mode<synchronous>, transform_indices = @transform_2, window_bounds = array<i64: 1, 16>}, {transform_indices = @transform_3, window_bounds = array<i64: 16, 16>}, {transform_indices = @transform_4, window_bounds = array<i64: 16, 1>}, {pipeline_mode = #tpu.pipeline_mode<synchronous>, transform_indices = @transform_5, window_bounds = array<i64: 1, 16>}, {pipeline_mode = #tpu.pipeline_mode<synchronous>, transform_indices = @transform_6, window_bounds = array<i64: 1, 16>}, {pipeline_mode = #tpu.pipeline_mode<synchronous>, transform_indices = @transform_7, window_bounds = array<i64: 1, 16>}, {pipeline_mode = #tpu.pipeline_mode<synchronous>, transform_indices = @transform_8, window_bounds = array<i64: 16, 64>}, {pipeline_mode = #tpu.pipeline_mode<synchronous>, transform_indices = @transform_9, window_bounds = array<i64: 1, 64>}, {pipeline_mode = #tpu.pipeline_mode<synchronous>, transform_indices = @transform_10, window_bounds = array<i64: 64, 16>}, {pipeline_mode = #tpu.pipeline_mode<synchronous>, transform_indices = @transform_11, window_bounds = array<i64: 1, 16>}, {pipeline_mode = #tpu.pipeline_mode<synchronous>, transform_indices = @transform_12, window_bounds = array<i64: 1, 16>}, {transform_indices = @transform_13, window_bounds = array<i64: 1, 16, 16>}]} {
    %c0 = arith.constant 0 : index
    %c0_0 = arith.constant 0 : index
    %c0_1 = arith.constant 0 : index
    %0 = vector.load %arg2[%c0, %c0_0, %c0_1] : memref<1x16x16xf32, #tpu.memory_space<vmem>>, vector<1x16x16xf32>
    %1 = vector.shape_cast %0 : vector<1x16x16xf32> to vector<16x16xf32>
    %c0_2 = arith.constant 0 : index
    %c0_3 = arith.constant 0 : index
    %2 = vector.load %arg3[%c0_2, %c0_3] : memref<1x16xf32, #tpu.memory_space<vmem>>, vector<1x16xf32>
    %3 = vector.broadcast %2 : vector<1x16xf32> to vector<16x16xf32>
    %4 = arith.mulf %3, %1 : vector<16x16xf32>
    %c0_4 = arith.constant 0 : index
    %c0_5 = arith.constant 0 : index
    %5 = vector.load %arg4[%c0_4, %c0_5] : memref<1x16xf32, #tpu.memory_space<vmem>>, vector<1x16xf32>
    %6 = vector.broadcast %5 : vector<1x16xf32> to vector<16x16xf32>
    %7 = arith.addf %4, %6 : vector<16x16xf32>
    %8 = arith.truncf %7 : vector<16x16xf32> to vector<16x16xbf16>
    %c0_6 = arith.constant 0 : index
    %c0_7 = arith.constant 0 : index
    %9 = vector.load %arg5[%c0_6, %c0_7] : memref<16x16xbf16, #tpu.memory_space<vmem>>, vector<16x16xbf16>
    %cst = arith.constant dense<0.000000e+00> : vector<16x16xf32>
    %10 = tpu.matmul %9, %8, %cst {dimension_numbers = #tpu.dot_dimension_numbers<[1], [0], [0], [1], [0, 0, 1, 1], [], []>} : vector<16x16xbf16>, vector<16x16xbf16>, vector<16x16xf32> -> vector<16x16xf32>
    %c0_8 = arith.constant 0 : index
    %c0_9 = arith.constant 0 : index
    %11 = vector.load %arg7[%c0_8, %c0_9] : memref<1x16xf32, #tpu.memory_space<vmem>>, vector<1x16xf32>
    %c0_10 = arith.constant 0 : index
    %c0_11 = arith.constant 0 : index
    %12 = vector.load %arg6[%c0_10, %c0_11] : memref<16x1xf32, #tpu.memory_space<vmem>>, vector<16x1xf32>
    %13 = vector.broadcast %12 : vector<16x1xf32> to vector<16x16xf32>
    %14 = arith.addf %10, %13 : vector<16x16xf32>
    %15 = vector.broadcast %11 : vector<1x16xf32> to vector<16x16xf32>
    %16 = arith.mulf %15, %14 : vector<16x16xf32>
    %17 = arith.addf %1, %16 : vector<16x16xf32>
    %c0_12 = arith.constant 0 : index
    %c0_13 = arith.constant 0 : index
    %18 = vector.load %arg8[%c0_12, %c0_13] : memref<1x16xf32, #tpu.memory_space<vmem>>, vector<1x16xf32>
    %19 = vector.broadcast %18 : vector<1x16xf32> to vector<16x16xf32>
    %20 = arith.mulf %19, %17 : vector<16x16xf32>
    %c0_14 = arith.constant 0 : index
    %c0_15 = arith.constant 0 : index
    %21 = vector.load %arg9[%c0_14, %c0_15] : memref<1x16xf32, #tpu.memory_space<vmem>>, vector<1x16xf32>
    %22 = vector.broadcast %21 : vector<1x16xf32> to vector<16x16xf32>
    %23 = arith.addf %20, %22 : vector<16x16xf32>
    %24 = arith.truncf %23 : vector<16x16xf32> to vector<16x16xbf16>
    %c0_16 = arith.constant 0 : index
    %c0_17 = arith.constant 0 : index
    %25 = vector.load %arg10[%c0_16, %c0_17] : memref<16x64xbf16, #tpu.memory_space<vmem>>, vector<16x64xbf16>
    %cst_18 = arith.constant dense<0.000000e+00> : vector<16x64xf32>
    %26 = tpu.matmul %24, %25, %cst_18 {dimension_numbers = #tpu.dot_dimension_numbers<[1], [0], [0], [1], [0, 0, 1, 1], [], []>} : vector<16x16xbf16>, vector<16x64xbf16>, vector<16x64xf32> -> vector<16x64xf32>
    %c0_19 = arith.constant 0 : index
    %c0_20 = arith.constant 0 : index
    %27 = vector.load %arg11[%c0_19, %c0_20] : memref<1x64xf32, #tpu.memory_space<vmem>>, vector<1x64xf32>
    %28 = vector.broadcast %27 : vector<1x64xf32> to vector<16x64xf32>
    %29 = arith.addf %26, %28 : vector<16x64xf32>
    %30 = arith.mulf %29, %29 : vector<16x64xf32>
    %31 = arith.mulf %29, %30 : vector<16x64xf32>
    %cst_21 = arith.constant 4.471500e-02 : f32
    %32 = vector.broadcast %cst_21 : f32 to vector<16x64xf32>
    %33 = arith.mulf %32, %31 : vector<16x64xf32>
    %34 = arith.addf %29, %33 : vector<16x64xf32>
    %cst_22 = arith.constant 0.797884583 : f32
    %35 = vector.broadcast %cst_22 : f32 to vector<16x64xf32>
    %36 = arith.mulf %35, %34 : vector<16x64xf32>
    %37 = math.tanh %36 : vector<16x64xf32>
    %cst_23 = arith.constant 1.000000e+00 : f32
    %38 = vector.broadcast %cst_23 : f32 to vector<16x64xf32>
    %39 = arith.addf %38, %37 : vector<16x64xf32>
    %cst_24 = arith.constant 5.000000e-01 : f32
    %40 = vector.broadcast %cst_24 : f32 to vector<16x64xf32>
    %41 = arith.mulf %40, %39 : vector<16x64xf32>
    %42 = arith.mulf %29, %41 : vector<16x64xf32>
    %43 = arith.truncf %42 : vector<16x64xf32> to vector<16x64xbf16>
    %c0_25 = arith.constant 0 : index
    %c0_26 = arith.constant 0 : index
    %44 = vector.load %arg12[%c0_25, %c0_26] : memref<64x16xbf16, #tpu.memory_space<vmem>>, vector<64x16xbf16>
    %cst_27 = arith.constant dense<0.000000e+00> : vector<16x16xf32>
    %45 = tpu.matmul %43, %44, %cst_27 {dimension_numbers = #tpu.dot_dimension_numbers<[1], [0], [0], [1], [0, 0, 1, 1], [], []>} : vector<16x64xbf16>, vector<64x16xbf16>, vector<16x16xf32> -> vector<16x16xf32>
    %c0_28 = arith.constant 0 : index
    %c0_29 = arith.constant 0 : index
    %46 = vector.load %arg16[%c0_28, %c0_29] : memref<16x16xf32, #tpu.memory_space<vmem>>, vector<16x16xf32>
    tpu.vector_store %arg16[%c0_28, %c0_29], %45 {strides = array<i32>} : memref<16x16xf32, #tpu.memory_space<vmem>>, vector<16x16xf32>,
    %c0_30 = arith.constant 0 : index
    %c0_31 = arith.constant 0 : index
    %47 = vector.load %arg13[%c0_30, %c0_31] : memref<1x16xf32, #tpu.memory_space<vmem>>, vector<1x16xf32>
    %c0_32 = arith.constant 0 : index
    %c0_33 = arith.constant 0 : index
    %48 = vector.load %arg16[%c0_32, %c0_33] : memref<16x16xf32, #tpu.memory_space<vmem>>, vector<16x16xf32>
    %49 = vector.broadcast %47 : vector<1x16xf32> to vector<16x16xf32>
    %50 = arith.mulf %49, %48 : vector<16x16xf32>
    %51 = arith.addf %17, %50 : vector<16x16xf32>
    %c0_34 = arith.constant 0 : index
    %c0_35 = arith.constant 0 : index
    %52 = vector.load %arg14[%c0_34, %c0_35] : memref<1x16xf32, #tpu.memory_space<vmem>>, vector<1x16xf32>
    %53 = vector.broadcast %52 : vector<1x16xf32> to vector<16x16xf32>
    %54 = arith.addf %51, %53 : vector<16x16xf32>
    %c0_36 = arith.constant 0 : index
    %c0_37 = arith.constant 0 : index
    %c0_38 = arith.constant 0 : index
    %55 = vector.load %arg15[%c0_36, %c0_37, %c0_38] : memref<1x16x16xf32, #tpu.memory_space<vmem>>, vector<1x16x16xf32>
    %56 = vector.shape_cast %55 : vector<1x16x16xf32> to vector<16x16xf32>
    %57 = vector.shape_cast %54 : vector<16x16xf32> to vector<1x16x16xf32>
    tpu.vector_store %arg15[%c0_36, %c0_37, %c0_38], %57 {strides = array<i32>} : memref<1x16x16xf32, #tpu.memory_space<vmem>>, vector<1x16x16xf32>,
    return
  }
  func.func @transform_0(%arg0: i32, %arg1: i32) -> (i32, i32, i32) {
    %c0_i32 = arith.constant 0 : i32
    %c0_i32_0 = arith.constant 0 : i32
    %c0_i32_1 = arith.constant 0 : i32
    return %arg0, %c0_i32, %c0_i32_0 : i32, i32, i32
  }
  func.func @transform_1(%arg0: i32, %arg1: i32) -> (i32, i32) {
    %c0_i32 = arith.constant 0 : i32
    %c0_i32_0 = arith.constant 0 : i32
    %c0_i32_1 = arith.constant 0 : i32
    return %c0_i32, %c0_i32_0 : i32, i32
  }
  func.func @transform_2(%arg0: i32, %arg1: i32) -> (i32, i32) {
    %c0_i32 = arith.constant 0 : i32
    %c0_i32_0 = arith.constant 0 : i32
    %c0_i32_1 = arith.constant 0 : i32
    return %c0_i32, %c0_i32_0 : i32, i32
  }
  func.func @transform_3(%arg0: i32, %arg1: i32) -> (i32, i32) {
    %c0_i32 = arith.constant 0 : i32
    %c0_i32_0 = arith.constant 0 : i32
    return %arg1, %c0_i32 : i32, i32
  }
  func.func @transform_4(%arg0: i32, %arg1: i32) -> (i32, i32) {
    %c0_i32 = arith.constant 0 : i32
    %c0_i32_0 = arith.constant 0 : i32
    return %arg1, %c0_i32 : i32, i32
  }
  func.func @transform_5(%arg0: i32, %arg1: i32) -> (i32, i32) {
    %c0_i32 = arith.constant 0 : i32
    %c0_i32_0 = arith.constant 0 : i32
    %c0_i32_1 = arith.constant 0 : i32
    return %c0_i32, %c0_i32_0 : i32, i32
  }
  func.func @transform_6(%arg0: i32, %arg1: i32) -> (i32, i32) {
    %c0_i32 = arith.constant 0 : i32
    %c0_i32_0 = arith.constant 0 : i32
    %c0_i32_1 = arith.constant 0 : i32
    return %c0_i32, %c0_i32_0 : i32, i32
  }
  func.func @transform_7(%arg0: i32, %arg1: i32) -> (i32, i32) {
    %c0_i32 = arith.constant 0 : i32
    %c0_i32_0 = arith.constant 0 : i32
    %c0_i32_1 = arith.constant 0 : i32
    return %c0_i32, %c0_i32_0 : i32, i32
  }
  func.func @transform_8(%arg0: i32, %arg1: i32) -> (i32, i32) {
    %c0_i32 = arith.constant 0 : i32
    %c0_i32_0 = arith.constant 0 : i32
    %c0_i32_1 = arith.constant 0 : i32
    return %c0_i32, %c0_i32_0 : i32, i32
  }
  func.func @transform_9(%arg0: i32, %arg1: i32) -> (i32, i32) {
    %c0_i32 = arith.constant 0 : i32
    %c0_i32_0 = arith.constant 0 : i32
    %c0_i32_1 = arith.constant 0 : i32
    return %c0_i32, %c0_i32_0 : i32, i32
  }
  func.func @transform_10(%arg0: i32, %arg1: i32) -> (i32, i32) {
    %c0_i32 = arith.constant 0 : i32
    %c0_i32_0 = arith.constant 0 : i32
    %c0_i32_1 = arith.constant 0 : i32
    return %c0_i32, %c0_i32_0 : i32, i32
  }
  func.func @transform_11(%arg0: i32, %arg1: i32) -> (i32, i32) {
    %c0_i32 = arith.constant 0 : i32
    %c0_i32_0 = arith.constant 0 : i32
    %c0_i32_1 = arith.constant 0 : i32
    return %c0_i32, %c0_i32_0 : i32, i32
  }
  func.func @transform_12(%arg0: i32, %arg1: i32) -> (i32, i32) {
    %c0_i32 = arith.constant 0 : i32
    %c0_i32_0 = arith.constant 0 : i32
    %c0_i32_1 = arith.constant 0 : i32
    return %c0_i32, %c0_i32_0 : i32, i32
  }
  func.func @transform_13(%arg0: i32, %arg1: i32) -> (i32, i32, i32) {
    %c0_i32 = arith.constant 0 : i32
    %c0_i32_0 = arith.constant 0 : i32
    return %arg0, %arg1, %c0_i32 : i32, i32, i32
  }
}

module attributes {stable_mosaic.version = 11 : i64} {
  func.func @resmlp_block_kernel(%arg0: i32, %arg1: i32, %arg2: memref<1x16x16xf32, #tpu.memory_space<vmem>>, %arg3: memref<1x16xf32, #tpu.memory_space<vmem>>, %arg4: memref<1x16xf32, #tpu.memory_space<vmem>>, %arg5: memref<16x16xbf16, #tpu.memory_space<vmem>>, %arg6: memref<16x1xf32, #tpu.memory_space<vmem>>, %arg7: memref<1x16xf32, #tpu.memory_space<vmem>>, %arg8: memref<1x16xf32, #tpu.memory_space<vmem>>, %arg9: memref<1x16xf32, #tpu.memory_space<vmem>>, %arg10: memref<16x64xbf16, #tpu.memory_space<vmem>>, %arg11: memref<1x64xf32, #tpu.memory_space<vmem>>, %arg12: memref<64x16xbf16, #tpu.memory_space<vmem>>, %arg13: memref<1x16xf32, #tpu.memory_space<vmem>>, %arg14: memref<1x16xf32, #tpu.memory_space<vmem>>, %arg15: memref<1x16x16xf32, #tpu.memory_space<vmem>>, %arg16: memref<16x16xf32, #tpu.memory_space<vmem>>) attributes {dimension_semantics = [#tpu.dimension_semantics<parallel>, #tpu.dimension_semantics<parallel>], iteration_bounds = array<i64: 2, 1>, scalar_prefetch = 0 : i64, scratch_operands = 1 : i64, tpu.core_type = #tpu.core_type<tc>, window_params = [{transform_indices = @transform_0, window_bounds = array<i64: 1, 16, 16>}, {pipeline_mode = #tpu.pipeline_mode<synchronous>, transform_indices = @transform_1, window_bounds = array<i64: 1, 16>}, {pipeline_mode = #tpu.pipeline_mode<synchronous>, transform_indices = @transform_2, window_bounds = array<i64: 1, 16>}, {transform_indices = @transform_3, window_bounds = array<i64: 16, 16>}, {transform_indices = @transform_4, window_bounds = array<i64: 16, 1>}, {pipeline_mode = #tpu.pipeline_mode<synchronous>, transform_indices = @transform_5, window_bounds = array<i64: 1, 16>}, {pipeline_mode = #tpu.pipeline_mode<synchronous>, transform_indices = @transform_6, window_bounds = array<i64: 1, 16>}, {pipeline_mode = #tpu.pipeline_mode<synchronous>, transform_indices = @transform_7, window_bounds = array<i64: 1, 16>}, {pipeline_mode = #tpu.pipeline_mode<synchronous>, transform_indices = @transform_8, window_bounds = array<i64: 16, 64>}, {pipeline_mode = #tpu.pipeline_mode<synchronous>, transform_indices = @transform_9, window_bounds = array<i64: 1, 64>}, {pipeline_mode = #tpu.pipeline_mode<synchronous>, transform_indices = @transform_10, window_bounds = array<i64: 64, 16>}, {pipeline_mode = #tpu.pipeline_mode<synchronous>, transform_indices = @transform_11, window_bounds = array<i64: 1, 16>}, {pipeline_mode = #tpu.pipeline_mode<synchronous>, transform_indices = @transform_12, window_bounds = array<i64: 1, 16>}, {transform_indices = @transform_13, window_bounds = array<i64: 1, 16, 16>}]} {
    %c0 = arith.constant 0 : index
    %c0_0 = arith.constant 0 : index
    %c0_1 = arith.constant 0 : index
    %0 = vector.load %arg2[%c0, %c0_0, %c0_1] : memref<1x16x16xf32, #tpu.memory_space<vmem>>, vector<1x16x16xf32>
    %1 = vector.shape_cast %0 : vector<1x16x16xf32> to vector<16x16xf32>
    %c0_2 = arith.constant 0 : index
    %c0_3 = arith.constant 0 : index
    %2 = vector.load %arg3[%c0_2, %c0_3] : memref<1x16xf32, #tpu.memory_space<vmem>>, vector<1x16xf32>
    %3 = vector.broadcast %2 : vector<1x16xf32> to vector<16x16xf32>
    %4 = arith.mulf %3, %1 : vector<16x16xf32>
    %c0_4 = arith.constant 0 : index
    %c0_5 = arith.constant 0 : index
    %5 = vector.load %arg4[%c0_4, %c0_5] : memref<1x16xf32, #tpu.memory_space<vmem>>, vector<1x16xf32>
    %6 = vector.broadcast %5 : vector<1x16xf32> to vector<16x16xf32>
    %7 = arith.addf %4, %6 : vector<16x16xf32>
    %8 = arith.truncf %7 : vector<16x16xf32> to vector<16x16xbf16>
    %c0_6 = arith.constant 0 : index
    %c0_7 = arith.constant 0 : index
    %9 = vector.load %arg5[%c0_6, %c0_7] : memref<16x16xbf16, #tpu.memory_space<vmem>>, vector<16x16xbf16>
    %cst = arith.constant dense<0.000000e+00> : vector<16x16xf32>
    %10 = tpu.matmul %9, %8, %cst {dimension_numbers = #tpu.dot_dimension_numbers<[1], [0], [0], [1], [0, 0, 1, 1], [], []>} : vector<16x16xbf16>, vector<16x16xbf16>, vector<16x16xf32> -> vector<16x16xf32>
    %c0_8 = arith.constant 0 : index
    %c0_9 = arith.constant 0 : index
    %11 = vector.load %arg7[%c0_8, %c0_9] : memref<1x16xf32, #tpu.memory_space<vmem>>, vector<1x16xf32>
    %c0_10 = arith.constant 0 : index
    %c0_11 = arith.constant 0 : index
    %12 = vector.load %arg6[%c0_10, %c0_11] : memref<16x1xf32, #tpu.memory_space<vmem>>, vector<16x1xf32>
    %13 = vector.broadcast %12 : vector<16x1xf32> to vector<16x16xf32>
    %14 = arith.addf %10, %13 : vector<16x16xf32>
    %15 = vector.broadcast %11 : vector<1x16xf32> to vector<16x16xf32>
    %16 = arith.mulf %15, %14 : vector<16x16xf32>
    %17 = arith.addf %1, %16 : vector<16x16xf32>
    %c0_12 = arith.constant 0 : index
    %c0_13 = arith.constant 0 : index
    %18 = vector.load %arg8[%c0_12, %c0_13] : memref<1x16xf32, #tpu.memory_space<vmem>>, vector<1x16xf32>
    %19 = vector.broadcast %18 : vector<1x16xf32> to vector<16x16xf32>
    %20 = arith.mulf %19, %17 : vector<16x16xf32>
    %c0_14 = arith.constant 0 : index
    %c0_15 = arith.constant 0 : index
    %21 = vector.load %arg9[%c0_14, %c0_15] : memref<1x16xf32, #tpu.memory_space<vmem>>, vector<1x16xf32>
    %22 = vector.broadcast %21 : vector<1x16xf32> to vector<16x16xf32>
    %23 = arith.addf %20, %22 : vector<16x16xf32>
    %24 = arith.truncf %23 : vector<16x16xf32> to vector<16x16xbf16>
    %c0_16 = arith.constant 0 : index
    %c0_17 = arith.constant 0 : index
    %25 = vector.load %arg10[%c0_16, %c0_17] : memref<16x64xbf16, #tpu.memory_space<vmem>>, vector<16x64xbf16>
    %cst_18 = arith.constant dense<0.000000e+00> : vector<16x64xf32>
    %26 = tpu.matmul %24, %25, %cst_18 {dimension_numbers = #tpu.dot_dimension_numbers<[1], [0], [0], [1], [0, 0, 1, 1], [], []>} : vector<16x16xbf16>, vector<16x64xbf16>, vector<16x64xf32> -> vector<16x64xf32>
    %c0_19 = arith.constant 0 : index
    %c0_20 = arith.constant 0 : index
    %27 = vector.load %arg11[%c0_19, %c0_20] : memref<1x64xf32, #tpu.memory_space<vmem>>, vector<1x64xf32>
    %28 = vector.broadcast %27 : vector<1x64xf32> to vector<16x64xf32>
    %29 = arith.addf %26, %28 : vector<16x64xf32>
    %30 = arith.mulf %29, %29 : vector<16x64xf32>
    %31 = arith.mulf %29, %30 : vector<16x64xf32>
    %cst_21 = arith.constant 4.471500e-02 : f32
    %32 = vector.broadcast %cst_21 : f32 to vector<16x64xf32>
    %33 = arith.mulf %32, %31 : vector<16x64xf32>
    %34 = arith.addf %29, %33 : vector<16x64xf32>
    %cst_22 = arith.constant 0.797884583 : f32
    %35 = vector.broadcast %cst_22 : f32 to vector<16x64xf32>
    %36 = arith.mulf %35, %34 : vector<16x64xf32>
    %37 = math.tanh %36 : vector<16x64xf32>
    %cst_23 = arith.constant 1.000000e+00 : f32
    %38 = vector.broadcast %cst_23 : f32 to vector<16x64xf32>
    %39 = arith.addf %38, %37 : vector<16x64xf32>
    %cst_24 = arith.constant 5.000000e-01 : f32
    %40 = vector.broadcast %cst_24 : f32 to vector<16x64xf32>
    %41 = arith.mulf %40, %39 : vector<16x64xf32>
    %42 = arith.mulf %29, %41 : vector<16x64xf32>
    %43 = arith.truncf %42 : vector<16x64xf32> to vector<16x64xbf16>
    %c0_25 = arith.constant 0 : index
    %c0_26 = arith.constant 0 : index
    %44 = vector.load %arg12[%c0_25, %c0_26] : memref<64x16xbf16, #tpu.memory_space<vmem>>, vector<64x16xbf16>
    %cst_27 = arith.constant dense<0.000000e+00> : vector<16x16xf32>
    %45 = tpu.matmul %43, %44, %cst_27 {dimension_numbers = #tpu.dot_dimension_numbers<[1], [0], [0], [1], [0, 0, 1, 1], [], []>} : vector<16x64xbf16>, vector<64x16xbf16>, vector<16x16xf32> -> vector<16x16xf32>
    %c0_28 = arith.constant 0 : index
    %c0_29 = arith.constant 0 : index
    %46 = vector.load %arg16[%c0_28, %c0_29] : memref<16x16xf32, #tpu.memory_space<vmem>>, vector<16x16xf32>
    tpu.vector_store %arg16[%c0_28, %c0_29], %45 {strides = array<i32>} : memref<16x16xf32, #tpu.memory_space<vmem>>, vector<16x16xf32>,
    %c0_30 = arith.constant 0 : index
    %c0_31 = arith.constant 0 : index
    %47 = vector.load %arg13[%c0_30, %c0_31] : memref<1x16xf32, #tpu.memory_space<vmem>>, vector<1x16xf32>
    %c0_32 = arith.constant 0 : index
    %c0_33 = arith.constant 0 : index
    %48 = vector.load %arg16[%c0_32, %c0_33] : memref<16x16xf32, #tpu.memory_space<vmem>>, vector<16x16xf32>
    %49 = vector.broadcast %47 : vector<1x16xf32> to vector<16x16xf32>
    %50 = arith.mulf %49, %48 : vector<16x16xf32>
    %51 = arith.addf %17, %50 : vector<16x16xf32>
    %c0_34 = arith.constant 0 : index
    %c0_35 = arith.constant 0 : index
    %52 = vector.load %arg14[%c0_34, %c0_35] : memref<1x16xf32, #tpu.memory_space<vmem>>, vector<1x16xf32>
    %53 = vector.broadcast %52 : vector<1x16xf32> to vector<16x16xf32>
    %54 = arith.addf %51, %53 : vector<16x16xf32>
    %c0_36 = arith.constant 0 : index
    %c0_37 = arith.constant 0 : index
    %c0_38 = arith.constant 0 : index
    %55 = vector.load %arg15[%c0_36, %c0_37, %c0_38] : memref<1x16x16xf32, #tpu.memory_space<vmem>>, vector<1x16x16xf32>
    %56 = vector.shape_cast %55 : vector<1x16x16xf32> to vector<16x16xf32>
    %57 = vector.shape_cast %54 : vector<16x16xf32> to vector<1x16x16xf32>
    tpu.vector_store %arg15[%c0_36, %c0_37, %c0_38], %57 {strides = array<i32>} : memref<1x16x16xf32, #tpu.memory_space<vmem>>, vector<1x16x16xf32>,
    return
  }
  func.func @transform_0(%arg0: i32, %arg1: i32) -> (i32, i32, i32) {
    %c0_i32 = arith.constant 0 : i32
    %c0_i32_0 = arith.constant 0 : i32
    %c0_i32_1 = arith.constant 0 : i32
    return %arg0, %c0_i32, %c0_i32_0 : i32, i32, i32
  }
  func.func @transform_1(%arg0: i32, %arg1: i32) -> (i32, i32) {
    %c0_i32 = arith.constant 0 : i32
    %c0_i32_0 = arith.constant 0 : i32
    %c0_i32_1 = arith.constant 0 : i32
    return %c0_i32, %c0_i32_0 : i32, i32
  }
  func.func @transform_2(%arg0: i32, %arg1: i32) -> (i32, i32) {
    %c0_i32 = arith.constant 0 : i32
    %c0_i32_0 = arith.constant 0 : i32
    %c0_i32_1 = arith.constant 0 : i32
    return %c0_i32, %c0_i32_0 : i32, i32
  }
  func.func @transform_3(%arg0: i32, %arg1: i32) -> (i32, i32) {
    %c0_i32 = arith.constant 0 : i32
    %c0_i32_0 = arith.constant 0 : i32
    return %arg1, %c0_i32 : i32, i32
  }
  func.func @transform_4(%arg0: i32, %arg1: i32) -> (i32, i32) {
    %c0_i32 = arith.constant 0 : i32
    %c0_i32_0 = arith.constant 0 : i32
    return %arg1, %c0_i32 : i32, i32
  }
  func.func @transform_5(%arg0: i32, %arg1: i32) -> (i32, i32) {
    %c0_i32 = arith.constant 0 : i32
    %c0_i32_0 = arith.constant 0 : i32
    %c0_i32_1 = arith.constant 0 : i32
    return %c0_i32, %c0_i32_0 : i32, i32
  }
  func.func @transform_6(%arg0: i32, %arg1: i32) -> (i32, i32) {
    %c0_i32 = arith.constant 0 : i32
    %c0_i32_0 = arith.constant 0 : i32
    %c0_i32_1 = arith.constant 0 : i32
    return %c0_i32, %c0_i32_0 : i32, i32
  }
  func.func @transform_7(%arg0: i32, %arg1: i32) -> (i32, i32) {
    %c0_i32 = arith.constant 0 : i32
    %c0_i32_0 = arith.constant 0 : i32
    %c0_i32_1 = arith.constant 0 : i32
    return %c0_i32, %c0_i32_0 : i32, i32
  }
  func.func @transform_8(%arg0: i32, %arg1: i32) -> (i32, i32) {
    %c0_i32 = arith.constant 0 : i32
    %c0_i32_0 = arith.constant 0 : i32
    %c0_i32_1 = arith.constant 0 : i32
    return %c0_i32, %c0_i32_0 : i32, i32
  }
  func.func @transform_9(%arg0: i32, %arg1: i32) -> (i32, i32) {
    %c0_i32 = arith.constant 0 : i32
    %c0_i32_0 = arith.constant 0 : i32
    %c0_i32_1 = arith.constant 0 : i32
    return %c0_i32, %c0_i32_0 : i32, i32
  }
  func.func @transform_10(%arg0: i32, %arg1: i32) -> (i32, i32) {
    %c0_i32 = arith.constant 0 : i32
    %c0_i32_0 = arith.constant 0 : i32
    %c0_i32_1 = arith.constant 0 : i32
    return %c0_i32, %c0_i32_0 : i32, i32
  }
  func.func @transform_11(%arg0: i32, %arg1: i32) -> (i32, i32) {
    %c0_i32 = arith.constant 0 : i32
    %c0_i32_0 = arith.constant 0 : i32
    %c0_i32_1 = arith.constant 0 : i32
    return %c0_i32, %c0_i32_0 : i32, i32
  }
  func.func @transform_12(%arg0: i32, %arg1: i32) -> (i32, i32) {
    %c0_i32 = arith.constant 0 : i32
    %c0_i32_0 = arith.constant 0 : i32
    %c0_i32_1 = arith.constant 0 : i32
    return %c0_i32, %c0_i32_0 : i32, i32
  }
  func.func @transform_13(%arg0: i32, %arg1: i32) -> (i32, i32, i32) {
    %c0_i32 = arith.constant 0 : i32
    %c0_i32_0 = arith.constant 0 : i32
    return %arg0, %arg1, %c0_i32 : i32, i32, i32
  }
}

</mosaic_0001>

<bundles_post_ra>
// kernel: tpu_custom_call.1
= control target key start
LH: loop header
LB: loop body
LE: loop exit
PB: predicated region body
PF: predicated region fallthrough
CT: control target
= control target key end

     0   :  { %18 = vsyncpa [#allocation4], 0  ;;  %s1385_s0 = inlined_call_operand.vmem [shape: f32[2,16,16], index: 0, kind: input, shape index: {}]   ;;  %s1386_s1 = inlined_call_operand.vmem [shape: f32[1,16], index: 1, kind: input, shape index: {}]   ;;  %s1387_s2 = inlined_call_operand.vmem [shape: f32[1,16], index: 2, kind: input, shape index: {}]   ;;  %s1388_s3 = inlined_call_operand.vmem [shape: bf16[16,16], index: 3, kind: input, shape index: {}]   ;;  %s1389_s4 = inlined_call_operand.vmem [shape: f32[16,1], index: 4, kind: input, shape index: {}]   ;;  %s1390_s5 = inlined_call_operand.vmem [shape: f32[1,16], index: 5, kind: input, shape index: {}]   ;;  %s1391_s6 = inlined_call_operand.vmem [shape: f32[1,16], index: 6, kind: input, shape index: {}]   ;;  %s1392_s7 = inlined_call_operand.vmem [shape: f32[1,16], index: 7, kind: input, shape index: {}]   ;;  %s1393_s8 = inlined_call_operand.vmem [shape: bf16[16,64], index: 8, kind: input, shape index: {}]   ;;  %s1394_s9 = inlined_call_operand.vmem [shape: f32[1,64], index: 9, kind: input, shape index: {}]   ;;  %s1395_s10 = inlined_call_operand.vmem [shape: bf16[64,16], index: 10, kind: input, shape index: {}]   ;;  %s1396_s11 = inlined_call_operand.vmem [shape: f32[1,16], index: 11, kind: input, shape index: {}]   ;;  %s1397_s12 = inlined_call_operand.vmem [shape: f32[1,16], index: 12, kind: input, shape index: {}]   ;;  %s1398_s13 = inlined_call_operand.hbm [shape: f32[2,16,16], index: 13, kind: output, shape index: {}]  }
   0x1   :  { %20 = vsyncpa [#allocation4 + $0x1], 0  ;;  %s1206_s25 = smov 0   ;;  %s1208_s26 = smov 0  }
   0x2   :  { %s1210_s27 = smov 0   ;;  %s1212_s28 = smov 0  }
   0x3   :  { %s1214_s29 = smov 0   ;;  %s1216_s30 = smov 0  }
   0x4 LB: > { %1402 = sst [smem:[#allocation6_spill]] %s1116_s27  ;;  %s914_s14 = sadd.s32 4294967295, %s1128_s30   ;;  %s1128_s30 = sphi %s1216_s30, %s26_s30   ;;  %s1124_s29 = sphi %s1214_s29, %s1411_s29   ;;  %s1120_s28 = sphi %s1212_s28, %s1410_s28   ;;  %s1116_s27 = sphi %s1210_s27, %s1414_s27   ;;  %s1112_s26 = sphi %s1208_s26, %s1413_s26   ;;  %s1108_s25 = sphi %s1206_s25, %s1412_s25  }
   0x5   : > { %1403 = sst [smem:[#allocation7_spill]] %s1124_s29  ;;  %s915_s15 = sadd.s32 4294967294, %s1128_s30  }
   0x6   : > { %s38_s16 = sadd.s32 1, %s1124_s29  ;;  %s335_s17 = sadd.s32 1, %s1116_s27 }
   0x7   : > { %p40_p0 = scmp.ge.s32.totalorder %s38_s16, 2  ;;  %p345_p1 = scmp.ne.s32.totalorder %s1116_s27, %s1112_s26 }
   0x8   : > { %p346_p2 = scmp.eq.s32.totalorder %s914_s14, 1  ;;  %p351_p3 = scmp.ne.s32.totalorder %s1112_s26, %s1108_s25 }
   0x9   : > { %s1416_s16 = smov (%p40_p0, %s38_s16), 0  ;;  %p352_p5 = scmp.eq.s32.totalorder %s915_s15, 1 }
   0xa   : > { %1404 = sst [smem:[#allocation8_spill]] %s1416_s16  ;;  %p1246_p4 = por %p346_p2, %p345_p1 }
   0xb   : > { %s330_s19 = ssub.s32 %s1124_s29, %s1416_s16  ;;  %p920_p6 = scmp.ge.s32.totalorder %s1128_s30, 1 }
   0xc   : > { %p333_p7 = scmp.eq.s32.totalorder %s330_s19, 0  ;;  %p1253_p8 = por %p352_p5, %p351_p3 }
   0xd   : > { %p426_p9 = scmp.lt.s32.totalorder %s1128_s30, 3 }
   0xe   : > { %s1259_s21 = scalar_select %p333_p7, %s1116_s27, %s335_s17  }
   0xf   : > { %p427_p10 = pnand %p920_p6, %p426_p9 }
  0x10   : > { %1407 = sst [smem:[#allocation9_spill]] %s1259_s21  ;;  %p480_p11 = scmp.lt.s32.totalorder (!%p427_p10), %s1120_s28, 1 }
  0x11   : > { %430 = sbr.rel (%p427_p10) target bundleno = 701 (0x2bd), region = 72  ;;  %s477_s23 = sand.u32 (!%p427_p10), 1, %s1112_s26  }
  0x12   : > { %s921_s16 = sshll.u32 (!%p427_p10), %s477_s23, 4 }
  0x13   : > { %s479_s14 = scalar_lea.vmem (!%p427_p10), [#allocation3], %s921_s16  ;;  %s1133_s16 = smov (!%p427_p10), [#allocation3]  }
  0x14   : > { %s811_s15 = sshll.u32 (!%p427_p10), %s479_s14, 4  ;;  %s1056_s29 = sshll.u32 (!%p427_p10), %s1133_s16, 4  ;;  %s1337_s15 = int_to_ptr.vmem [resolvable:$true] %s811_s15  ;;  %s1057_s29 = int_to_ptr.vmem [resolvable:$false] %s1056_s29 }
  0x15   : > { %s1058_s21 = scalar_lea.vmem (!%p427_p10), %s1057_s29, 512  ;;  %p1059_p1 = scmp.lt.s32.totalorder (!%p427_p10), %s1337_s15, %s1057_s29 }
  0x16   : > { %v1130_v0 = vmov 0.0   ;;  %s481_s22 = scalar_select %p480_p11, %s1120_s28, 1  ;;  %vm1131_vm0 = vmmov 0   ;;  %v523_v1 = vld [vmem:[%s1389_s4] sm:$0xff]  ;;  %v1132_v3 = vmov 0   ;;  %v524_v5 = vld [vmem:[%s1389_s4 + $0x8] sm:$0xff] }
  0x17   : > { %957 = vmatprep.subr.bf16.mxu1 %v1130_v0  ;;  %969 = vmatprep.subr.bf16.mxu0 %v1130_v0  ;;  %v924_v2 = vld [vmem:[%s1386_s1] ss:$0 sm:$0xff]  ;;  %vm540_vm1 = vcmask 130048   ;;  %v1044_v35 = vld [vmem:[%s1395_s10 + $0x18] sm:$0xff]   ;;  %v1045_v36 = vld [vmem:[%s1395_s10 + $0x10] sm:$0xff]   ;;  %vm724_vm2 = vcmask 523264  }
  0x18   : > { %959 = vmatprep.mubr.msk.bf16.mxu1 %vm1131_vm0, %v1130_v0  ;;  %977 = vmatprep.mubr.msk.bf16.mxu0 %vm1131_vm0, %v1130_v0  ;;  %s946_s17 = sshll.u32 %s481_s22, 4  ;;  %v925_v4 = vld [vmem:[%s1387_s2] ss:$0 sm:$0xff]  ;;  %v1046_v37 = vld [vmem:[%s1395_s10 + $0x8] sm:$0xff]   ;;  %s1052_s22 = scalar_lea.vmem %s1337_s15, 256 }
  0x19   : > { %1041 = vset.pattern.permute.xlu0 %v1132_v3  ;;  %s484_s27 = scalar_lea.vmem %s1385_s0, %s946_s17  ;;  %v1042_v13 = vld [vmem:[%s1388_s3] sm:$0xff]   ;;  %970 = vmatpush3.bf16.msra.mxu0 %v1044_v35  ;;  %p1053_p12 = scmp.ne.s32.totalorder %s1337_s15, %s1052_s22 }
  0x1a   : > { %527 = vperm.xlu0 %1041, %v523_v1   ;;  %v499_v6 = vld [vmem:[%s484_s27] sm:$0xff]  ;;  %v500_v7 = vld [vmem:[%s484_s27 + $0x8] sm:$0xff]  ;;  %971 = vmatprep.subr.bf16.mxu0 %v1130_v0  ;;  %s947_s27 = sshll.u32 %s1120_s28, 8  ;;  %s1340_s28 = scalar_lea.sflag [#allocation4], %s477_s23 }
  0x1b   : > { %v508_v8 = vmul.f32 %v924_v2, %v499_v6  ;;  %v509_v9 = vmul.f32 %v924_v2, %v500_v7  ;;  %v1043_v14 = vld [vmem:[%s1393_s8] sm:$0xff]   ;;  %s1335_s24 = scalar_lea.hbm %s1398_s13, %s947_s27  ;;  %p1054_p13 = pnand %p1053_p12, %p1246_p4 }
  0x1c   : > { %v928_v16 = vld [vmem:[%s1390_s5] ss:$0 sm:$0xff]  ;;  %p1060_p2 = scmp.lt.s32.totalorder %s1058_s21, %s1052_s22 }
  0x1d   : > { %v517_v10 = vadd.f32 %v925_v4, %v508_v8  ;;  %v518_v11 = vadd.f32 %v925_v4, %v509_v9  ;;  %v929_v25 = vld [vmem:[%s1391_s6] ss:$0 sm:$0xff]  ;;  %972 = vmatpush3.bf16.msra.mxu0 %v1045_v36  ;;  %p1055_p0 = pneg %p1054_p13 }
  0x1e   : > { %532 = vperm.xlu0 %1041, %v524_v5   ;;  %v930_v30 = vld [vmem:[%s1392_s7] ss:$0 sm:$0xff]  ;;  %973 = vmatprep.subr.bf16.mxu0 %v1130_v0  ;;  %p1061_p3 = por %p1060_p2, %p1059_p1 }
  0x1f   : > { %v519_v12 = vpack.c.bf16 %v518_v11, %v517_v10  ;;  %v1047_v38 = vld [vmem:[%s1395_s10] sm:$0xff]  }
  0x20   : > { %v931_v39 = vld [vmem:[%s1394_s9] ss:$0 sm:$0xff]  ;;  %p1062_p5 = pnand %p1061_p3, %p1055_p0 }
  0x21   : > { %958 = vmatpush3.bf16.msra.mxu1 %v519_v12  ;;  %974 = vmatpush3.bf16.msra.mxu0 %v1046_v37  ;;  %v939_v5 = vld [vmem:[%s1396_s11] ss:$0 sm:$0xff] }
  0x22   : > { %963 = vmatprep.subr.bf16.mxu1 %v1130_v0  ;;  %975 = vmatprep.subr.bf16.mxu0 %v1130_v0  ;;  %v940_v8 = vld [vmem:[%s1397_s12] ss:$0 sm:$0xff] }
  0x24   : > { %960 = vmatmul.mubr.msk.bf16.vlgmr.msra.gmra.mxu1 %vm540_vm1, %v1042_v13 }
  0x25   : > { %965 = vmatprep.mubr.msk.bf16.mxu1 %vm1131_vm0, %v1130_v0  ;;  %964 = vmatpush3.bf16.msra.mxu1 %v1043_v14 }
  0x26   : > { %976 = vmatpush3.bf16.msra.mxu0 %v1047_v38 }
  0x95   : > { %v528_v15 = vpop.permute.xlu0 %527 }
  0x99   : > { %v533_v21 = vpop.permute.xlu0 %532 }
  0xe4   : > { %v578_v17 = vpop.f32.mrf.mxu1 }
  0xe5   : > { %v579_v18 = vadd.f32 %v578_v17, %v528_v15 }
  0xe6   : > { %v961_v19 = vpop.f32.mrf.mxu1 }
  0xe7   : > { %v591_v20 = vmul.f32 %v928_v16, %v579_v18 }
  0xe8   : > { %v581_v22 = vpop.f32.mrf.mxu1 }
  0xe9   : > { %v1291_v23 = vadd.f32 %v591_v20, %v499_v6  ;;  %v582_v24 = vadd.f32 %v581_v22, %v533_v21 }
  0xea   : > { %v962_v26 = vpop.f32.mrf.mxu1 }
  0xeb   : > { %v592_v27 = vmul.f32 %v928_v16, %v582_v24  ;;  %v602_v28 = vmul.f32 %v929_v25, %v1291_v23 }
  0xed   : > { %v1297_v29 = vadd.f32 %v592_v27, %v500_v7  ;;  %v611_v32 = vadd.f32 %v930_v30, %v602_v28 }
  0xef   : > { %v603_v31 = vmul.f32 %v929_v25, %v1297_v29 }
  0xf1   : > { %v612_v33 = vadd.f32 %v930_v30, %v603_v31 }
  0xf3   : > { %v613_v34 = vpack.c.bf16 %v612_v33, %v611_v32 }
  0xf5   : > { %966 = vmatmul.mubr.msk.bf16.vlgmr.msra.gmra.mxu1 %vm540_vm1, %v613_v34 }
 0x1b5   : > { %v666_v40 = vpop.f32.mrf.mxu1 }
 0x1b6   : > { %v667_v41 = vadd.f32 %v931_v39, %v666_v40 }
 0x1b7   : > { %v967_v42 = vpop.f32.mrf.mxu1 }
 0x1b8   : > { %v673_v43 = vmul.f32 %v667_v41, %v667_v41 }
 0x1b9   : > { %v669_v44 = vpop.f32.mrf.mxu1 }
 0x1ba   : > { %v675_v45 = vmul.f32 %v673_v43, %v667_v41  ;;  %v670_v46 = vadd.f32 %v931_v39, %v669_v44 }
 0x1bb   : > { %v968_v47 = vpop.f32.mrf.mxu1 }
 0x1bc   : > { %v677_v48 = vmul.f32 0.044715, %v675_v45  ;;  %v674_v49 = vmul.f32 %v670_v46, %v670_v46 }
 0x1be   : > { %v679_v50 = vadd.f32 %v677_v48, %v667_v41  ;;  %v676_v51 = vmul.f32 %v674_v49, %v670_v46 }
 0x1c0   : > { %v681_v52 = vmul.f32 0.7978846, %v679_v50  ;;  %v678_v53 = vmul.f32 0.044715, %v676_v51 }
 0x1c2   : > { %1048 = vtanh.f32 %v681_v52  ;;  %v680_v54 = vadd.f32 %v678_v53, %v670_v46 }
 0x1c4   : > { %v682_v55 = vmul.f32 0.7978846, %v680_v54 }
 0x1c6   : > { %1050 = vtanh.f32 %v682_v55 }
 0x1cf   : > { %v1049_v56 = vpop.eup %1048 }
 0x1d0   : > { %v685_v57 = vadd.f32 1.0, %v1049_v56 }
 0x1d2   : > { %v687_v59 = vmul.f32 0.5, %v685_v57 }
 0x1d3   : > { %v1051_v58 = vpop.eup %1050 }
 0x1d4   : > { %v686_v60 = vadd.f32 1.0, %v1051_v58  ;;  %v689_v62 = vmul.f32 %v687_v59, %v667_v41 }
 0x1d6   : > { %v688_v61 = vmul.f32 0.5, %v686_v60 }
 0x1d8   : > { %v690_v63 = vmul.f32 %v688_v61, %v670_v46 }
 0x1da   : > { %v691_v0 = vpack.c.bf16 %v690_v63, %v689_v62 }
 0x1dc   : > { %978 = vmatmul.mubr.msk.bf16.vlgmr.msra.gmra.mxu0 %vm724_vm2, %v691_v0 }
 0x29c   : > { %v762_v1 = vpop.f32.mrf.mxu0 }
 0x29d   : > { %769 = vst.msk [vmem:[#allocation2] sm:$0xff] %vm540_vm1, %v762_v1 }
 0x29e   : > { %v979_v2 = vpop.f32.mrf.mxu0 }
 0x2a0   : > { %v765_v3 = vpop.f32.mrf.mxu0 }
 0x2a1   : > { %770 = vst.msk [vmem:[#allocation2 + $0x8] sm:$0xff] %vm540_vm1, %v765_v3 }
 0x2a2   : > { %v980_v4 = vpop.f32.mrf.mxu0 }
 0x2a4   : > { %v772_v6 = vld [vmem:[#allocation2] sm:$0xff] }
 0x2a5   : > { %v780_v7 = vmul.f32 %v939_v5, %v772_v6 }
 0x2a7   : > { %v782_v9 = vadd.f32 %v780_v7, %v1291_v23 }
 0x2a8   : > { %v773_v10 = vld [vmem:[#allocation2 + $0x8] sm:$0xff] }
 0x2a9   : > { %v781_v11 = vmul.f32 %v939_v5, %v773_v10  ;;  %v791_v12 = vadd.f32 %v940_v8, %v782_v9 }
 0x2ab   : > { %v783_v13 = vadd.f32 %v781_v11, %v1297_v29  ;;  %793 = vst.msk [vmem:[%s479_s14] sm:$0xff] %vm540_vm1, %v791_v12 }
 0x2ad   : > { %v792_v14 = vadd.f32 %v940_v8, %v783_v13 }
 0x2af   : > { %794 = vst.msk [vmem:[%s479_s14 + $0x8] sm:$0xff] %vm540_vm1, %v792_v14 }
 0x2b0   : > { %1065 = shalt.err (!%p1062_p5)
}
 0x2b1   : > { %s1066_s23 = scalar_lea.hbm %s1335_s24, 256  ;;  %s1070_s17 = scalar_lea.hbm %s1398_s13, 512 }
 0x2b2   : > { %p1067_p6 = scmp.ne.s32.totalorder %s1335_s24, %s1066_s23  ;;  %p1071_p10 = scmp.lt.s32.totalorder %s1335_s24, %s1398_s13 }
 0x2b3   : > { %p1072_p11 = scmp.lt.s32.totalorder %s1070_s17, %s1066_s23 }
 0x2b4   : > { %p1068_p7 = pnand %p1067_p6, %p1246_p4 }
 0x2b5   : > { %p1073_p12 = por %p1072_p11, %p1071_p10 }
 0x2b6   : > { %p1069_p9 = pneg %p1068_p7 }
 0x2b8   : > { %p1074_p13 = pnand %p1073_p12, %p1069_p9 }
 0x2ba   : > { %1077 = shalt.err (!%p1074_p13)
}
 0x2bb   : > { %s1134_s22 = smov 128   ;;  %s1135_s29 = smov 8  }
 0x2bc   : > { %981 = dma.vmem_to_hbm [thread:$0]  (%p1246_p4), %s1337_s15, 256, %s1335_s24, %s1340_s28, %s1134_s22, %s1134_s22, %s1135_s29  }
 0x2bd PF: > { %p987_p0 = scmp.ge.s32.totalorder %s1128_s30, 2  ;;  %s826_s21 = sand.u32 1, %s1108_s25  }
 0x2be   : > { %s827_s23 = scalar_lea.sflag [#allocation4], %s826_s21 }
 0x2bf   : > { %p984_p1 = pnand %p987_p0, %p1253_p8 }
 0x2c1   : > { %p985_p2 = pneg %p984_p1 }
 0x2c3   : > { %1103 = dma.done.wait (%p985_p2), %s827_s23, 256  }
 0x2c4   : > { %1105 = vsyncadd (%p985_p2), %s827_s23, 4294967040  ;;  %s26_s30 = sadd.s32 1, %s1128_s30   ;;  %s1408_s27 = sld [smem:[#allocation6_spill]] }
 0x2c5   : > { %p23_p3 = scmp.ge.s32.totalorder %s26_s30, 4   ;;  %s1409_s14 = sld [smem:[#allocation9_spill]] }
 0x2c6   : > { %s1410_s28 = sld [smem:[#allocation7_spill]]  ;;  %s1412_s25 = smov %s1112_s26 }
 0x2c7   : > { %s1411_s29 = sld [smem:[#allocation8_spill]]  ;;  %25 = sbr.rel (!%p23_p3) target bundleno = 4 (0x4), region = 113 }
 0x2ca   : > { %s1413_s26 = smov %s1408_s27 }
 0x2cb   : > { %s1414_s27 = smov %s1409_s14 }
 0x2cc   :  { %832 = vsyncpa [#allocation4], 1 }
 0x2cd   :  { %834 = vsyncpa [#allocation4 + $0x1], 1 }

// kernel: tpu_custom_call.1
= control target key start
LH: loop header
LB: loop body
LE: loop exit
PB: predicated region body
PF: predicated region fallthrough
CT: control target
= control target key end

     0   :  { %18 = vsyncpa [#allocation4], 0  ;;  %s1385_s0 = inlined_call_operand.vmem [shape: f32[2,16,16], index: 0, kind: input, shape index: {}]   ;;  %s1386_s1 = inlined_call_operand.vmem [shape: f32[1,16], index: 1, kind: input, shape index: {}]   ;;  %s1387_s2 = inlined_call_operand.vmem [shape: f32[1,16], index: 2, kind: input, shape index: {}]   ;;  %s1388_s3 = inlined_call_operand.vmem [shape: bf16[16,16], index: 3, kind: input, shape index: {}]   ;;  %s1389_s4 = inlined_call_operand.vmem [shape: f32[16,1], index: 4, kind: input, shape index: {}]   ;;  %s1390_s5 = inlined_call_operand.vmem [shape: f32[1,16], index: 5, kind: input, shape index: {}]   ;;  %s1391_s6 = inlined_call_operand.vmem [shape: f32[1,16], index: 6, kind: input, shape index: {}]   ;;  %s1392_s7 = inlined_call_operand.vmem [shape: f32[1,16], index: 7, kind: input, shape index: {}]   ;;  %s1393_s8 = inlined_call_operand.vmem [shape: bf16[16,64], index: 8, kind: input, shape index: {}]   ;;  %s1394_s9 = inlined_call_operand.vmem [shape: f32[1,64], index: 9, kind: input, shape index: {}]   ;;  %s1395_s10 = inlined_call_operand.vmem [shape: bf16[64,16], index: 10, kind: input, shape index: {}]   ;;  %s1396_s11 = inlined_call_operand.vmem [shape: f32[1,16], index: 11, kind: input, shape index: {}]   ;;  %s1397_s12 = inlined_call_operand.vmem [shape: f32[1,16], index: 12, kind: input, shape index: {}]   ;;  %s1398_s13 = inlined_call_operand.hbm [shape: f32[2,16,16], index: 13, kind: output, shape index: {}]  }
   0x1   :  { %20 = vsyncpa [#allocation4 + $0x1], 0  ;;  %s1206_s25 = smov 0   ;;  %s1208_s26 = smov 0  }
   0x2   :  { %s1210_s27 = smov 0   ;;  %s1212_s28 = smov 0  }
   0x3   :  { %s1214_s29 = smov 0   ;;  %s1216_s30 = smov 0  }
   0x4 LB: > { %1402 = sst [smem:[#allocation6_spill]] %s1116_s27  ;;  %s914_s14 = sadd.s32 4294967295, %s1128_s30   ;;  %s1128_s30 = sphi %s1216_s30, %s26_s30   ;;  %s1124_s29 = sphi %s1214_s29, %s1411_s29   ;;  %s1120_s28 = sphi %s1212_s28, %s1410_s28   ;;  %s1116_s27 = sphi %s1210_s27, %s1414_s27   ;;  %s1112_s26 = sphi %s1208_s26, %s1413_s26   ;;  %s1108_s25 = sphi %s1206_s25, %s1412_s25  }
   0x5   : > { %1403 = sst [smem:[#allocation7_spill]] %s1124_s29  ;;  %s915_s15 = sadd.s32 4294967294, %s1128_s30  }
   0x6   : > { %s38_s16 = sadd.s32 1, %s1124_s29  ;;  %s335_s17 = sadd.s32 1, %s1116_s27 }
   0x7   : > { %p40_p0 = scmp.ge.s32.totalorder %s38_s16, 2  ;;  %p345_p1 = scmp.ne.s32.totalorder %s1116_s27, %s1112_s26 }
   0x8   : > { %p346_p2 = scmp.eq.s32.totalorder %s914_s14, 1  ;;  %p351_p3 = scmp.ne.s32.totalorder %s1112_s26, %s1108_s25 }
   0x9   : > { %s1416_s16 = smov (%p40_p0, %s38_s16), 0  ;;  %p352_p5 = scmp.eq.s32.totalorder %s915_s15, 1 }
   0xa   : > { %1404 = sst [smem:[#allocation8_spill]] %s1416_s16  ;;  %p1246_p4 = por %p346_p2, %p345_p1 }
   0xb   : > { %s330_s19 = ssub.s32 %s1124_s29, %s1416_s16  ;;  %p920_p6 = scmp.ge.s32.totalorder %s1128_s30, 1 }
   0xc   : > { %p333_p7 = scmp.eq.s32.totalorder %s330_s19, 0  ;;  %p1253_p8 = por %p352_p5, %p351_p3 }
   0xd   : > { %p426_p9 = scmp.lt.s32.totalorder %s1128_s30, 3 }
   0xe   : > { %s1259_s21 = scalar_select %p333_p7, %s1116_s27, %s335_s17  }
   0xf   : > { %p427_p10 = pnand %p920_p6, %p426_p9 }
  0x10   : > { %1407 = sst [smem:[#allocation9_spill]] %s1259_s21  ;;  %p480_p11 = scmp.lt.s32.totalorder (!%p427_p10), %s1120_s28, 1 }
  0x11   : > { %430 = sbr.rel (%p427_p10) target bundleno = 701 (0x2bd), region = 72  ;;  %s477_s23 = sand.u32 (!%p427_p10), 1, %s1112_s26  }
  0x12   : > { %s921_s16 = sshll.u32 (!%p427_p10), %s477_s23, 4 }
  0x13   : > { %s479_s14 = scalar_lea.vmem (!%p427_p10), [#allocation3], %s921_s16  ;;  %s1133_s16 = smov (!%p427_p10), [#allocation3]  }
  0x14   : > { %s811_s15 = sshll.u32 (!%p427_p10), %s479_s14, 4  ;;  %s1056_s29 = sshll.u32 (!%p427_p10), %s1133_s16, 4  ;;  %s1337_s15 = int_to_ptr.vmem [resolvable:$true] %s811_s15  ;;  %s1057_s29 = int_to_ptr.vmem [resolvable:$false] %s1056_s29 }
  0x15   : > { %s1058_s21 = scalar_lea.vmem (!%p427_p10), %s1057_s29, 512  ;;  %p1059_p1 = scmp.lt.s32.totalorder (!%p427_p10), %s1337_s15, %s1057_s29 }
  0x16   : > { %v1130_v0 = vmov 0.0   ;;  %s481_s22 = scalar_select %p480_p11, %s1120_s28, 1  ;;  %vm1131_vm0 = vmmov 0   ;;  %v523_v1 = vld [vmem:[%s1389_s4] sm:$0xff]  ;;  %v1132_v3 = vmov 0   ;;  %v524_v5 = vld [vmem:[%s1389_s4 + $0x8] sm:$0xff] }
  0x17   : > { %957 = vmatprep.subr.bf16.mxu1 %v1130_v0  ;;  %969 = vmatprep.subr.bf16.mxu0 %v1130_v0  ;;  %v924_v2 = vld [vmem:[%s1386_s1] ss:$0 sm:$0xff]  ;;  %vm540_vm1 = vcmask 130048   ;;  %v1044_v35 = vld [vmem:[%s1395_s10 + $0x18] sm:$0xff]   ;;  %v1045_v36 = vld [vmem:[%s1395_s10 + $0x10] sm:$0xff]   ;;  %vm724_vm2 = vcmask 523264  }
  0x18   : > { %959 = vmatprep.mubr.msk.bf16.mxu1 %vm1131_vm0, %v1130_v0  ;;  %977 = vmatprep.mubr.msk.bf16.mxu0 %vm1131_vm0, %v1130_v0  ;;  %s946_s17 = sshll.u32 %s481_s22, 4  ;;  %v925_v4 = vld [vmem:[%s1387_s2] ss:$0 sm:$0xff]  ;;  %v1046_v37 = vld [vmem:[%s1395_s10 + $0x8] sm:$0xff]   ;;  %s1052_s22 = scalar_lea.vmem %s1337_s15, 256 }
  0x19   : > { %1041 = vset.pattern.permute.xlu0 %v1132_v3  ;;  %s484_s27 = scalar_lea.vmem %s1385_s0, %s946_s17  ;;  %v1042_v13 = vld [vmem:[%s1388_s3] sm:$0xff]   ;;  %970 = vmatpush3.bf16.msra.mxu0 %v1044_v35  ;;  %p1053_p12 = scmp.ne.s32.totalorder %s1337_s15, %s1052_s22 }
  0x1a   : > { %527 = vperm.xlu0 %1041, %v523_v1   ;;  %v499_v6 = vld [vmem:[%s484_s27] sm:$0xff]  ;;  %v500_v7 = vld [vmem:[%s484_s27 + $0x8] sm:$0xff]  ;;  %971 = vmatprep.subr.bf16.mxu0 %v1130_v0  ;;  %s947_s27 = sshll.u32 %s1120_s28, 8  ;;  %s1340_s28 = scalar_lea.sflag [#allocation4], %s477_s23 }
  0x1b   : > { %v508_v8 = vmul.f32 %v924_v2, %v499_v6  ;;  %v509_v9 = vmul.f32 %v924_v2, %v500_v7  ;;  %v1043_v14 = vld [vmem:[%s1393_s8] sm:$0xff]   ;;  %s1335_s24 = scalar_lea.hbm %s1398_s13, %s947_s27  ;;  %p1054_p13 = pnand %p1053_p12, %p1246_p4 }
  0x1c   : > { %v928_v16 = vld [vmem:[%s1390_s5] ss:$0 sm:$0xff]  ;;  %p1060_p2 = scmp.lt.s32.totalorder %s1058_s21, %s1052_s22 }
  0x1d   : > { %v517_v10 = vadd.f32 %v925_v4, %v508_v8  ;;  %v518_v11 = vadd.f32 %v925_v4, %v509_v9  ;;  %v929_v25 = vld [vmem:[%s1391_s6] ss:$0 sm:$0xff]  ;;  %972 = vmatpush3.bf16.msra.mxu0 %v1045_v36  ;;  %p1055_p0 = pneg %p1054_p13 }
  0x1e   : > { %532 = vperm.xlu0 %1041, %v524_v5   ;;  %v930_v30 = vld [vmem:[%s1392_s7] ss:$0 sm:$0xff]  ;;  %973 = vmatprep.subr.bf16.mxu0 %v1130_v0  ;;  %p1061_p3 = por %p1060_p2, %p1059_p1 }
  0x1f   : > { %v519_v12 = vpack.c.bf16 %v518_v11, %v517_v10  ;;  %v1047_v38 = vld [vmem:[%s1395_s10] sm:$0xff]  }
  0x20   : > { %v931_v39 = vld [vmem:[%s1394_s9] ss:$0 sm:$0xff]  ;;  %p1062_p5 = pnand %p1061_p3, %p1055_p0 }
  0x21   : > { %958 = vmatpush3.bf16.msra.mxu1 %v519_v12  ;;  %974 = vmatpush3.bf16.msra.mxu0 %v1046_v37  ;;  %v939_v5 = vld [vmem:[%s1396_s11] ss:$0 sm:$0xff] }
  0x22   : > { %963 = vmatprep.subr.bf16.mxu1 %v1130_v0  ;;  %975 = vmatprep.subr.bf16.mxu0 %v1130_v0  ;;  %v940_v8 = vld [vmem:[%s1397_s12] ss:$0 sm:$0xff] }
  0x24   : > { %960 = vmatmul.mubr.msk.bf16.vlgmr.msra.gmra.mxu1 %vm540_vm1, %v1042_v13 }
  0x25   : > { %965 = vmatprep.mubr.msk.bf16.mxu1 %vm1131_vm0, %v1130_v0  ;;  %964 = vmatpush3.bf16.msra.mxu1 %v1043_v14 }
  0x26   : > { %976 = vmatpush3.bf16.msra.mxu0 %v1047_v38 }
  0x95   : > { %v528_v15 = vpop.permute.xlu0 %527 }
  0x99   : > { %v533_v21 = vpop.permute.xlu0 %532 }
  0xe4   : > { %v578_v17 = vpop.f32.mrf.mxu1 }
  0xe5   : > { %v579_v18 = vadd.f32 %v578_v17, %v528_v15 }
  0xe6   : > { %v961_v19 = vpop.f32.mrf.mxu1 }
  0xe7   : > { %v591_v20 = vmul.f32 %v928_v16, %v579_v18 }
  0xe8   : > { %v581_v22 = vpop.f32.mrf.mxu1 }
  0xe9   : > { %v1291_v23 = vadd.f32 %v591_v20, %v499_v6  ;;  %v582_v24 = vadd.f32 %v581_v22, %v533_v21 }
  0xea   : > { %v962_v26 = vpop.f32.mrf.mxu1 }
  0xeb   : > { %v592_v27 = vmul.f32 %v928_v16, %v582_v24  ;;  %v602_v28 = vmul.f32 %v929_v25, %v1291_v23 }
  0xed   : > { %v1297_v29 = vadd.f32 %v592_v27, %v500_v7  ;;  %v611_v32 = vadd.f32 %v930_v30, %v602_v28 }
  0xef   : > { %v603_v31 = vmul.f32 %v929_v25, %v1297_v29 }
  0xf1   : > { %v612_v33 = vadd.f32 %v930_v30, %v603_v31 }
  0xf3   : > { %v613_v34 = vpack.c.bf16 %v612_v33, %v611_v32 }
  0xf5   : > { %966 = vmatmul.mubr.msk.bf16.vlgmr.msra.gmra.mxu1 %vm540_vm1, %v613_v34 }
 0x1b5   : > { %v666_v40 = vpop.f32.mrf.mxu1 }
 0x1b6   : > { %v667_v41 = vadd.f32 %v931_v39, %v666_v40 }
 0x1b7   : > { %v967_v42 = vpop.f32.mrf.mxu1 }
 0x1b8   : > { %v673_v43 = vmul.f32 %v667_v41, %v667_v41 }
 0x1b9   : > { %v669_v44 = vpop.f32.mrf.mxu1 }
 0x1ba   : > { %v675_v45 = vmul.f32 %v673_v43, %v667_v41  ;;  %v670_v46 = vadd.f32 %v931_v39, %v669_v44 }
 0x1bb   : > { %v968_v47 = vpop.f32.mrf.mxu1 }
 0x1bc   : > { %v677_v48 = vmul.f32 0.044715, %v675_v45  ;;  %v674_v49 = vmul.f32 %v670_v46, %v670_v46 }
 0x1be   : > { %v679_v50 = vadd.f32 %v677_v48, %v667_v41  ;;  %v676_v51 = vmul.f32 %v674_v49, %v670_v46 }
 0x1c0   : > { %v681_v52 = vmul.f32 0.7978846, %v679_v50  ;;  %v678_v53 = vmul.f32 0.044715, %v676_v51 }
 0x1c2   : > { %1048 = vtanh.f32 %v681_v52  ;;  %v680_v54 = vadd.f32 %v678_v53, %v670_v46 }
 0x1c4   : > { %v682_v55 = vmul.f32 0.7978846, %v680_v54 }
 0x1c6   : > { %1050 = vtanh.f32 %v682_v55 }
 0x1cf   : > { %v1049_v56 = vpop.eup %1048 }
 0x1d0   : > { %v685_v57 = vadd.f32 1.0, %v1049_v56 }
 0x1d2   : > { %v687_v59 = vmul.f32 0.5, %v685_v57 }
 0x1d3   : > { %v1051_v58 = vpop.eup %1050 }
 0x1d4   : > { %v686_v60 = vadd.f32 1.0, %v1051_v58  ;;  %v689_v62 = vmul.f32 %v687_v59, %v667_v41 }
 0x1d6   : > { %v688_v61 = vmul.f32 0.5, %v686_v60 }
 0x1d8   : > { %v690_v63 = vmul.f32 %v688_v61, %v670_v46 }
 0x1da   : > { %v691_v0 = vpack.c.bf16 %v690_v63, %v689_v62 }
 0x1dc   : > { %978 = vmatmul.mubr.msk.bf16.vlgmr.msra.gmra.mxu0 %vm724_vm2, %v691_v0 }
 0x29c   : > { %v762_v1 = vpop.f32.mrf.mxu0 }
 0x29d   : > { %769 = vst.msk [vmem:[#allocation2] sm:$0xff] %vm540_vm1, %v762_v1 }
 0x29e   : > { %v979_v2 = vpop.f32.mrf.mxu0 }
 0x2a0   : > { %v765_v3 = vpop.f32.mrf.mxu0 }
 0x2a1   : > { %770 = vst.msk [vmem:[#allocation2 + $0x8] sm:$0xff] %vm540_vm1, %v765_v3 }
 0x2a2   : > { %v980_v4 = vpop.f32.mrf.mxu0 }
 0x2a4   : > { %v772_v6 = vld [vmem:[#allocation2] sm:$0xff] }
 0x2a5   : > { %v780_v7 = vmul.f32 %v939_v5, %v772_v6 }
 0x2a7   : > { %v782_v9 = vadd.f32 %v780_v7, %v1291_v23 }
 0x2a8   : > { %v773_v10 = vld [vmem:[#allocation2 + $0x8] sm:$0xff] }
 0x2a9   : > { %v781_v11 = vmul.f32 %v939_v5, %v773_v10  ;;  %v791_v12 = vadd.f32 %v940_v8, %v782_v9 }
 0x2ab   : > { %v783_v13 = vadd.f32 %v781_v11, %v1297_v29  ;;  %793 = vst.msk [vmem:[%s479_s14] sm:$0xff] %vm540_vm1, %v791_v12 }
 0x2ad   : > { %v792_v14 = vadd.f32 %v940_v8, %v783_v13 }
 0x2af   : > { %794 = vst.msk [vmem:[%s479_s14 + $0x8] sm:$0xff] %vm540_vm1, %v792_v14 }
 0x2b0   : > { %1065 = shalt.err (!%p1062_p5)
}
 0x2b1   : > { %s1066_s23 = scalar_lea.hbm %s1335_s24, 256  ;;  %s1070_s17 = scalar_lea.hbm %s1398_s13, 512 }
 0x2b2   : > { %p1067_p6 = scmp.ne.s32.totalorder %s1335_s24, %s1066_s23  ;;  %p1071_p10 = scmp.lt.s32.totalorder %s1335_s24, %s1398_s13 }
 0x2b3   : > { %p1072_p11 = scmp.lt.s32.totalorder %s1070_s17, %s1066_s23 }
 0x2b4   : > { %p1068_p7 = pnand %p1067_p6, %p1246_p4 }
 0x2b5   : > { %p1073_p12 = por %p1072_p11, %p1071_p10 }
 0x2b6   : > { %p1069_p9 = pneg %p1068_p7 }
 0x2b8   : > { %p1074_p13 = pnand %p1073_p12, %p1069_p9 }
 0x2ba   : > { %1077 = shalt.err (!%p1074_p13)
}
 0x2bb   : > { %s1134_s22 = smov 128   ;;  %s1135_s29 = smov 8  }
 0x2bc   : > { %981 = dma.vmem_to_hbm [thread:$0]  (%p1246_p4), %s1337_s15, 256, %s1335_s24, %s1340_s28, %s1134_s22, %s1134_s22, %s1135_s29  }
 0x2bd PF: > { %p987_p0 = scmp.ge.s32.totalorder %s1128_s30, 2  ;;  %s826_s21 = sand.u32 1, %s1108_s25  }
 0x2be   : > { %s827_s23 = scalar_lea.sflag [#allocation4], %s826_s21 }
 0x2bf   : > { %p984_p1 = pnand %p987_p0, %p1253_p8 }
 0x2c1   : > { %p985_p2 = pneg %p984_p1 }
 0x2c3   : > { %1103 = dma.done.wait (%p985_p2), %s827_s23, 256  }
 0x2c4   : > { %1105 = vsyncadd (%p985_p2), %s827_s23, 4294967040  ;;  %s26_s30 = sadd.s32 1, %s1128_s30   ;;  %s1408_s27 = sld [smem:[#allocation6_spill]] }
 0x2c5   : > { %p23_p3 = scmp.ge.s32.totalorder %s26_s30, 4   ;;  %s1409_s14 = sld [smem:[#allocation9_spill]] }
 0x2c6   : > { %s1410_s28 = sld [smem:[#allocation7_spill]]  ;;  %s1412_s25 = smov %s1112_s26 }
 0x2c7   : > { %s1411_s29 = sld [smem:[#allocation8_spill]]  ;;  %25 = sbr.rel (!%p23_p3) target bundleno = 4 (0x4), region = 113 }
 0x2ca   : > { %s1413_s26 = smov %s1408_s27 }
 0x2cb   : > { %s1414_s27 = smov %s1409_s14 }
 0x2cc   :  { %832 = vsyncpa [#allocation4], 1 }
 0x2cd   :  { %834 = vsyncpa [#allocation4 + $0x1], 1 }

</bundles_post_ra>
